<compile_context>
chip_gen: v7x
topology: tpu7x:2x2x1
jax: 0.10.0
libtpu: 0.0.40
codegen_flags: <defaults>
</compile_context>

<pallas_src>
import functools

import jax
import jax.numpy as jnp
from jax.experimental import pallas as pl
from jax.experimental.pallas import tpu as pltpu


def _round_up(x, m):
    return (x + m - 1) // m * m


def _cdiv(a, b):
    return -(-a // b)


# ---------------------------------------------------------------------------
# Kernels for the 'strided' pairing style.
#   out[n, c*volume + i] = f[n, i*channels + c]     (fixed permutation of lanes)
# ---------------------------------------------------------------------------

def _strided_mxu_kernel(f_ref, p_ref, o_ref, *, precision):
    """Lane permutation as a one-hot matmul on the MXU.

    f_ref: (tm, d) lane-dense rows; p_ref: (d, d) constant one-hot permutation
    matrix (resident in VMEM across all grid steps); o_ref: (tm, d).
    The MXU occupies its own VLIW slot, so the shuffle is free filler under the
    HBM DMA pipeline and the kernel stays at the memory roofline.
    """
    o_ref[...] = jnp.dot(
        f_ref[...], p_ref[...],
        precision=precision,
        preferred_element_type=jnp.float32,
    ).astype(o_ref.dtype)


def _strided_xlu_kernel(f_ref, o_ref, *, volume, channels):
    """Fallback permutation (swapaxes on the (tm, volume, C) view).

    Used for non-float dtypes, and for very wide rows where the O(d^2) one-hot
    matmul would no longer hide under the DMA on v5e's slower MXU.
    """
    tm = f_ref.shape[0]
    f = f_ref[...].reshape(tm, volume, channels)
    o_ref[...] = jnp.swapaxes(f, 1, 2).reshape(tm, volume * channels)


def voxel_unshuffle(features, indices, spatial_shape, batch_size, *, scale,
                    pairing_style="sequential"):
    """JAX/Pallas equivalent of VoxelUnshuffle.forward.

    Returns (new_features, new_indices, new_spatial_shape, batch_size)
    in place of a SparseConvTensor.
    """
    volume = scale ** 3
    n_total, channels = features.shape
    n_orig = indices.shape[0]                        # == len(ind_dict)
    assert n_total == n_orig * volume, "features count must be N_orig * scale**3"
    d = channels * volume

    # Glue (plain JAX / Python): indices pass-through + downscaled spatial shape.
    new_indices = indices.astype(jnp.int32)
    new_spatial_shape = [int(dim // scale) for dim in spatial_shape]

    # Lane-dense view of the features: a free, contiguous row-major reshape.
    f2 = features.reshape(n_orig, d)

    if pairing_style == "sequential":
        # Pure reshape -> zero-cost metadata op in XLA; no kernel launch needed.
        return f2, new_indices, new_spatial_shape, batch_size

    assert pairing_style == "strided", f"unknown pairing_style: {pairing_style}"

    # TODO(synk): if the consumer of new_features is a linear layer, permute its
    # weight rows once at init time and return the plain reshape (kernel-free).

    dtype = features.dtype
    itemsize = jnp.dtype(dtype).itemsize
    pack = max(8, 32 // itemsize)        # sublane multiple (8 f32 / 16 bf16 / 32 i8)
    row_bytes = d * itemsize

    # ---- tile sizing (bytes-driven) -----------------------------------------
    TARGET_TILE_BYTES = 4 * 1024 * 1024  # >=4 MiB tiles amortize per-step overhead
    MIN_TILE_BYTES = 1 * 1024 * 1024     # never shrink below this just to add steps
    MIN_STEPS = 8                        # >=4 iters per TC on the 2-TC v7x

    tm_cap = max(pack, (TARGET_TILE_BYTES // row_bytes) // pack * pack)
    if tm_cap >= n_orig:
        tm = n_orig                      # single block == full array dim (always legal)
    else:
        tm = tm_cap                      # multiple of `pack`; ragged last block masked
    steps = _cdiv(n_orig, tm)
    if steps < MIN_STEPS and n_orig * row_bytes >= MIN_STEPS * MIN_TILE_BYTES:
        # Big enough tensor: give each TensorCore several iterations of overlap.
        tm = max(pack, _round_up(_cdiv(n_orig, MIN_STEPS), pack))
        steps = _cdiv(n_orig, tm)
    # No wrapper-side pad or trailing slice: Pallas masks the ragged last block.

    # MXU one-hot path only when the O(d^2) MAC cost stays hidden under the DMA
    # on every generation (v5e is the binding constraint).
    use_mxu = bool(jnp.issubdtype(dtype, jnp.floating)) and (
        d <= (256 if itemsize >= 4 else 512))

    # TODO(synk): when volume*channels % 128 != 0 (e.g. scale=3), pad the lane
    # dim to the next multiple of 128 to avoid per-row masked vst tails.
    common = dict(
        out_shape=jax.ShapeDtypeStruct((n_orig, d), dtype),
        compiler_params=pltpu.CompilerParams(
            dimension_semantics=("parallel",),
            # <= v7x's 64 MiB physical VMEM; big enough for 4 MiB double-buffered
            # tiles + the resident permutation matrix on v5e/v6e as well.
            vmem_limit_bytes=48 * 1024 * 1024,
        ),
    )

    if use_mxu:
        # Constant one-hot permutation: input column i*C + c -> output column
        # c*volume + i, so out = f @ P with P[j, perm[j]] = 1.
        cols = jnp.arange(d, dtype=jnp.int32)
        perm = (cols % channels) * volume + (cols // channels)
        p_mat = (perm[:, None] == jnp.arange(d, dtype=jnp.int32)[None, :]).astype(dtype)

        precision = (jax.lax.Precision.HIGHEST if itemsize >= 4
                     else jax.lax.Precision.DEFAULT)   # exact either way for one-hot
        kernel = functools.partial(_strided_mxu_kernel, precision=precision)

        new_features = pl.pallas_call(
            kernel,
            grid_spec=pltpu.PrefetchScalarGridSpec(
                num_scalar_prefetch=0,
                grid=(steps,),
                in_specs=[
                    pl.BlockSpec((tm, d), lambda i: (i, 0)),
                    # Constant block index -> DMA'd once, stays resident in VMEM.
                    pl.BlockSpec((d, d), lambda i: (0, 0)),
                ],
                out_specs=pl.BlockSpec((tm, d), lambda i: (i, 0)),
            ),
            cost_estimate=pl.CostEstimate(
                flops=2 * n_orig * d * d,
                transcendentals=0,
                bytes_accessed=2 * n_orig * row_bytes + d * d * itemsize,
            ),
            **common,
        )(f2, p_mat)
    else:
        kernel = functools.partial(
            _strided_xlu_kernel, volume=volume, channels=channels)
        new_features = pl.pallas_call(
            kernel,
            grid_spec=pltpu.PrefetchScalarGridSpec(
                num_scalar_prefetch=0,
                grid=(steps,),
                in_specs=[pl.BlockSpec((tm, d), lambda i: (i, 0))],
                out_specs=pl.BlockSpec((tm, d), lambda i: (i, 0)),
            ),
            cost_estimate=pl.CostEstimate(
                flops=0,
                transcendentals=0,
                bytes_accessed=2 * n_orig * row_bytes,
            ),
            **common,
        )(f2)

    return new_features, new_indices, new_spatial_shape, batch_size


if __name__ == "__main__":
    key = jax.random.PRNGKey(0)

    scale = 2
    volume = scale ** 3              # 8
    batch_size = 2
    spatial_shape = [16, 16, 16]     # upscaled spatial shape

    def reference(feats, n_orig, style):
        r = feats.reshape(n_orig, volume, -1)
        if style == "strided":
            r = jnp.transpose(r, (0, 2, 1))
        return r.reshape(n_orig, -1)

    # (n_orig, channels, dtype):
    #   n_orig=37 exercises the ragged / masked last block (no pad, no slice),
    #   bf16 exercises the f32-accumulate MXU path,
    #   int32 exercises the swapaxes fallback path.
    cases = [
        (37, 16, jnp.float32),
        (40, 16, jnp.bfloat16),
        (16, 16, jnp.int32),
    ]

    for case_idx, (n_orig, channels, dtype) in enumerate(cases):
        kf, ki = jax.random.split(jax.random.fold_in(key, case_idx))
        if jnp.issubdtype(dtype, jnp.floating):
            features = jax.random.normal(
                kf, (n_orig * volume, channels), dtype=jnp.float32).astype(dtype)
        else:
            features = jax.random.randint(
                kf, (n_orig * volume, channels), -100, 100, dtype=dtype)
        # ind_dict keys represented as [N_orig, 4] int coords (batch, z, y, x)
        indices = jax.random.randint(ki, (n_orig, 4), 0, 8, dtype=jnp.int32)

        for style in ("sequential", "strided"):
            out_feats, out_inds, new_shape, bs = voxel_unshuffle(
                features, indices, spatial_shape, batch_size,
                scale=scale, pairing_style=style)
            out_feats = jax.block_until_ready(out_feats)

            ref = reference(features, n_orig, style)
            assert out_feats.shape == (n_orig, volume * channels)
            assert out_feats.dtype == features.dtype
            if jnp.issubdtype(dtype, jnp.floating):
                assert jnp.allclose(
                    out_feats.astype(jnp.float32), ref.astype(jnp.float32),
                    rtol=1e-6, atol=1e-6), f"mismatch: dtype={dtype}, style={style}"
            else:
                assert jnp.array_equal(out_feats, ref), \
                    f"mismatch: dtype={dtype}, style={style}"
            assert out_inds.shape == indices.shape
            assert new_shape == [8, 8, 8]
            assert bs == batch_size

    print("KERNEL_OK")
</pallas_src>

<mosaic_0001>
module attributes {stable_mosaic.version = 11 : i64} {
  func.func @_strided_mxu_kernel(%arg0: i32, %arg1: memref<37x128xf32, #tpu.memory_space<vmem>>, %arg2: memref<128x128xf32, #tpu.memory_space<vmem>>, %arg3: memref<37x128xf32, #tpu.memory_space<vmem>>) attributes {dimension_semantics = [#tpu.dimension_semantics<parallel>], iteration_bounds = array<i64: 1>, scalar_prefetch = 0 : i64, scratch_operands = 0 : i64, tpu.core_type = #tpu.core_type<tc>, window_params = [{transform_indices = @transform_0, window_bounds = array<i64: 37, 128>}, {pipeline_mode = #tpu.pipeline_mode<synchronous>, transform_indices = @transform_1, window_bounds = array<i64: 128, 128>}, {transform_indices = @transform_2, window_bounds = array<i64: 37, 128>}]} {
    %c0 = arith.constant 0 : index
    %c0_0 = arith.constant 0 : index
    %0 = vector.load %arg1[%c0, %c0_0] : memref<37x128xf32, #tpu.memory_space<vmem>>, vector<37x128xf32>
    %c0_1 = arith.constant 0 : index
    %c0_2 = arith.constant 0 : index
    %1 = vector.load %arg2[%c0_1, %c0_2] : memref<128x128xf32, #tpu.memory_space<vmem>>, vector<128x128xf32>
    %cst = arith.constant dense<0.000000e+00> : vector<37x128xf32>
    %2 = tpu.matmul %0, %1, %cst {dimension_numbers = #tpu.dot_dimension_numbers<[1], [0], [0], [1], [0, 0, 1, 1], [], []>, precision = #tpu.contract_precision<fp32>} : vector<37x128xf32>, vector<128x128xf32>, vector<37x128xf32> -> vector<37x128xf32>
    %c0_3 = arith.constant 0 : index
    %c0_4 = arith.constant 0 : index
    %3 = vector.load %arg3[%c0_3, %c0_4] : memref<37x128xf32, #tpu.memory_space<vmem>>, vector<37x128xf32>
    tpu.vector_store %arg3[%c0_3, %c0_4], %2 {strides = array<i32>} : memref<37x128xf32, #tpu.memory_space<vmem>>, vector<37x128xf32>,
    return
  }
  func.func @transform_0(%arg0: i32) -> (i32, i32) {
    %c0_i32 = arith.constant 0 : i32
    %c0_i32_0 = arith.constant 0 : i32
    return %arg0, %c0_i32 : i32, i32
  }
  func.func @transform_1(%arg0: i32) -> (i32, i32) {
    %c0_i32 = arith.constant 0 : i32
    %c0_i32_0 = arith.constant 0 : i32
    %c0_i32_1 = arith.constant 0 : i32
    return %c0_i32, %c0_i32_0 : i32, i32
  }
  func.func @transform_2(%arg0: i32) -> (i32, i32) {
    %c0_i32 = arith.constant 0 : i32
    %c0_i32_0 = arith.constant 0 : i32
    return %arg0, %c0_i32 : i32, i32
  }
}

</mosaic_0001>

<bundles_post_ra>
// kernel: tpu_custom_call.1
= control target key start
LH: loop header
LB: loop body
LE: loop exit
PB: predicated region body
PF: predicated region fallthrough
CT: control target
= control target key end

     0   :  { %7 = vsyncpa [#allocation3], 0  ;;  %s2009_s0 = inlined_call_operand.hbm [shape: f32[37,128], index: 0, kind: input, shape index: {}]   ;;  %s2010_s1 = inlined_call_operand.hbm [shape: f32[128,128], index: 1, kind: input, shape index: {}]   ;;  %s2011_s2 = inlined_call_operand.hbm [shape: f32[37,128], index: 2, kind: output, shape index: {}]  }
   0x1   :  { %8 = vsyncpa [#allocation6], 0 }
   0x2   :  { %9 = vsyncpa [#allocation4], 0  ;;  %s1574_s9 = smov [#allocation2]   ;;  %s1502_s13 = scalar_lea.hbm %s2009_s0, 640 }
   0x3   :  { %s15_s10 = sshll.u32 %s1574_s9, 4  ;;  %p1503_p0 = scmp.ne.s32.totalorder %s2009_s0, %s1502_s13  ;;  %s16_s10 = int_to_ptr.vmem [resolvable:$true] %s15_s10 }
   0x4   :  { %p1506_p1 = scmp.lt.u32.totalorder %s1502_s13, %s2009_s0 }
   0x6   :  { %p1508_p2 = pnand %p1506_p1, %p1503_p0 }
   0x8   :  { %1511 = shalt.err (!%p1508_p2)
}
   0x9   :  { %s1512_s18 = scalar_lea.vmem %s16_s10, 640  ;;  %p1517_p4 = scmp.lt.s32.totalorder %s16_s10, %s16_s10 }
   0xa   :  { %p1513_p3 = scmp.ne.s32.totalorder %s16_s10, %s1512_s18  ;;  %p1518_p5 = scmp.lt.s32.totalorder %s1512_s18, %s1512_s18 }
   0xc   :  { %p1519_p6 = por %p1518_p5, %p1517_p4 }
   0xe   :  { %p1520_p7 = pnand %p1519_p6, %p1513_p3 }
  0x10   :  { %1523 = shalt.err (!%p1520_p7)
}
  0x11   :  { %s1575_s19 = smov 128   ;;  %s1576_s20 = smov 8  }
  0x12   :  { %21 = dma.hbm_to_vmem [thread:$0]  %s2009_s0, 640, %s16_s10, [#allocation3], %s1575_s19, %s1575_s19, %s1576_s20  }
  0x13   :  { %s1577_s23 = smov [#allocation5]   ;;  %s1524_s27 = scalar_lea.hbm %s2010_s1, 2048 }
  0x14   :  { %s27_s24 = sshll.u32 %s1577_s23, 4  ;;  %p1525_p8 = scmp.ne.s32.totalorder %s2010_s1, %s1524_s27  ;;  %s28_s24 = int_to_ptr.vmem [resolvable:$true] %s27_s24 }
  0x15   :  { %p1528_p9 = scmp.lt.u32.totalorder %s1524_s27, %s2010_s1 }
  0x17   :  { %p1530_p10 = pnand %p1528_p9, %p1525_p8 }
  0x19   :  { %1533 = shalt.err (!%p1530_p10)
}
  0x1a   :  { %s1534_s4 = scalar_lea.vmem %s28_s24, 2048  ;;  %p1539_p12 = scmp.lt.s32.totalorder %s28_s24, %s28_s24 }
  0x1b   :  { %p1535_p11 = scmp.ne.s32.totalorder %s28_s24, %s1534_s4  ;;  %p1540_p13 = scmp.lt.s32.totalorder %s1534_s4, %s1534_s4 }
  0x1d   :  { %p1541_p0 = por %p1540_p13, %p1539_p12 }
  0x1f   :  { %p1542_p1 = pnand %p1541_p0, %p1535_p11 }
  0x21   :  { %1545 = shalt.err (!%p1542_p1)
}
  0x22   :  { %33 = dma.hbm_to_vmem [thread:$0]  %s2010_s1, 2048, %s28_s24, [#allocation6], %s1575_s19, %s1575_s19, %s1576_s20  }
  0x23   :  { %1568 = dma.done.wait [#allocation3], 640  }
  0x24   :  { %1569 = vsyncadd [#allocation3], 4294966656 }
  0x25   :  { %1570 = dma.done.wait [#allocation6], 2048  }
  0x26   :  { %1571 = vsyncadd [#allocation6], 4294965248  ;;  %v1578_v0 = vmov 0.0|0.0   ;;  %vm1579_vm0 = vmmov 0   ;;  %v1580_v1 = vmov 0.0   ;;  %v45_v2 = vld [vmem:[#allocation5] sm:$0xff] }
  0x27   :  { %1305 = vmatprep.subr.bf16.mxu1 %v1578_v0  ;;  %1377 = vmatprep.subr.bf16.mxu0 %v1578_v0  ;;  %v46_v3 = vld [vmem:[#allocation5 + $0x8] sm:$0xff]  ;;  %v47_v4 = vld [vmem:[#allocation5 + $0x10] sm:$0xff]  ;;  %v62_v5 = vand.u32 4294901760, %v45_v2  ;;  %v48_v7 = vld [vmem:[#allocation5 + $0x18] sm:$0xff]  ;;  %s1581_s1 = smov [#allocation7]  }
  0x28   :  { %1055 = vmatprep.mubr.msk.f32.mxu1 %vm1579_vm0, %v1580_v1  ;;  %1196 = vmatprep.mubr.msk.f32.mxu0 %vm1579_vm0, %v1580_v1  ;;  %v65_v6 = vand.u32 4294901760, %v46_v3  ;;  %v68_v8 = vand.u32 4294901760, %v47_v4  ;;  %v71_v9 = vand.u32 4294901760, %v48_v7  ;;  %v49_v10 = vld [vmem:[#allocation5 + $0x20] sm:$0xff]  ;;  %v50_v11 = vld [vmem:[#allocation5 + $0x28] sm:$0xff]  ;;  %v1641_v16 = vld [vmem:[#allocation5 + $0x30] sm:$0xff] }
  0x29   :  { %v74_v14 = vand.u32 4294901760, %v49_v10  ;;  %v77_v15 = vand.u32 4294901760, %v50_v11  ;;  %v1643_v17 = vld [vmem:[#allocation5 + $0x38] sm:$0xff]  ;;  %v80_v19 = vand.u32 4294901760, %v1641_v16  ;;  %v1653_v21 = vld [vmem:[#allocation5 + $0x40] sm:$0xff]  ;;  %v1655_v22 = vld [vmem:[#allocation5 + $0x48] sm:$0xff]  ;;  %v1673_v30 = vsub.f32 %v45_v2, %v62_v5 }
  0x2a   :  { %v1633_v12 = vpack.c.bf16 %v65_v6, %v62_v5  ;;  %v1637_v13 = vpack.c.bf16 %v71_v9, %v68_v8  ;;  %v83_v20 = vand.u32 4294901760, %v1643_v17  ;;  %v40_v23 = vld [vmem:[#allocation2] sm:$0xff]  ;;  %v86_v25 = vand.u32 4294901760, %v1653_v21  ;;  %v1667_v27 = vld [vmem:[#allocation5 + $0x50] sm:$0xff]  ;;  %v1687_v35 = vld [vmem:[#allocation5 + $0x60] sm:$0xff]  ;;  %s884_s6 = sshll.u32 %s1581_s1, 4  ;;  %s885_s6 = int_to_ptr.vmem [resolvable:$true] %s884_s6 }
  0x2b   :  { %v1647_v18 = vpack.c.bf16 %v77_v15, %v74_v14  ;;  %v89_v26 = vand.u32 4294901760, %v1655_v22  ;;  %v1669_v28 = vld [vmem:[#allocation5 + $0x58] sm:$0xff]  ;;  %v1671_v29 = vand.u32 4294901760, %v40_v23  ;;  %v1675_v31 = vsub.f32 %v46_v3, %v65_v6  ;;  %v41_v36 = vld [vmem:[#allocation2 + $0x8] sm:$0xff]  ;;  %v1691_v37 = vld [vmem:[#allocation5 + $0x68] sm:$0xff]  ;;  %s1546_s7 = scalar_lea.vmem %s885_s6, 640  ;;  %p1551_p3 = scmp.lt.s32.totalorder %s885_s6, %s885_s6 }
  0x2c   :  { %1307 = vmatpush3.bf16.msra.mxu1 %v1633_v12  ;;  %1379 = vmatpush3.bf16.msra.mxu0 %v1633_v12  ;;  %v1661_v24 = vpack.c.bf16 %v83_v20, %v80_v19  ;;  %v92_v33 = vand.u32 4294901760, %v1667_v27  ;;  %v95_v34 = vand.u32 4294901760, %v1669_v28  ;;  %v1693_v38 = vsub.f32 %v47_v4, %v68_v8  ;;  %v1712_v45 = vld [vmem:[#allocation5 + $0x70] sm:$0xff]  ;;  %v1714_v46 = vld [vmem:[#allocation5 + $0x78] sm:$0xff]  ;;  %v42_v49 = vld [vmem:[#allocation2 + $0x10] sm:$0xff]  ;;  %p1547_p2 = scmp.ne.s32.totalorder %s885_s6, %s1546_s7  ;;  %p1552_p4 = scmp.lt.s32.totalorder %s1546_s7, %s1546_s7 }
  0x2d   :  { %1308 = vmatprep.subr.bf16.mxu1 %v1578_v0  ;;  %1380 = vmatprep.subr.bf16.mxu0 %v1578_v0  ;;  %v1683_v32 = vpack.c.bf16 %v89_v26, %v86_v25  ;;  %v1696_v39 = vsub.f32 %v40_v23, %v1671_v29  ;;  %v1698_v40 = vsub.f32 %v48_v7, %v71_v9  ;;  %v98_v41 = vand.u32 4294901760, %v1687_v35  ;;  %v43_v62 = vld [vmem:[#allocation2 + $0x18] sm:$0xff] }
  0x2e   :  { %v1701_v42 = vand.u32 4294901760, %v41_v36  ;;  %v1709_v43 = vpack.c.bf16 %v95_v34, %v92_v33  ;;  %v101_v44 = vand.u32 4294901760, %v1691_v37  ;;  %v195_v47 = vand.u32 4294901760, %v1673_v30  ;;  %p1553_p5 = por %p1552_p4, %p1551_p3 }
  0x2f   :  { %v202_v48 = vand.u32 4294901760, %v1675_v31  ;;  %v1720_v50 = vsub.f32 %v49_v10, %v74_v14  ;;  %v1722_v51 = vsub.f32 %v50_v11, %v77_v15  ;;  %v144_v52 = vand.u32 4294901760, %v1696_v39 }
  0x30   :  { %1310 = vmatpush3.bf16.msra.mxu1 %v1637_v13  ;;  %1382 = vmatpush3.bf16.msra.mxu0 %v1637_v13  ;;  %v209_v53 = vand.u32 4294901760, %v1693_v38  ;;  %v2013_v54 = vand.u32 4294901760, %v1712_v45  ;;  %v2012_v55 = vand.u32 4294901760, %v1714_v46  ;;  %v1729_v56 = vsub.f32 %v41_v36, %v1701_v42  ;;  %p1554_p6 = pnand %p1553_p5, %p1547_p2 }
  0x31   :  { %1311 = vmatprep.subr.bf16.mxu1 %v1578_v0  ;;  %1383 = vmatprep.subr.bf16.mxu0 %v1578_v0  ;;  %v1731_v57 = vand.u32 4294901760, %v42_v49  ;;  %v1739_v58 = vpack.c.bf16 %v101_v44, %v98_v41  ;;  %v196_v59 = vsub.f32 %v1673_v30, %v195_v47  ;;  %v203_v60 = vsub.f32 %v1675_v31, %v202_v48 }
  0x32   :  { %v216_v61 = vand.u32 4294901760, %v1698_v40  ;;  %v1745_v63 = vsub.f32 %v1641_v16, %v80_v19  ;;  %v145_v2 = vsub.f32 %v1696_v39, %v144_v52  ;;  %v210_v3 = vsub.f32 %v1693_v38, %v209_v53  ;;  %v44_v16 = vld [vmem:[#allocation2 + $0x20] sm:$0x1f] }
  0x33   :  { %v223_v4 = vand.u32 4294901760, %v1720_v50  ;;  %v2014_v5 = vand.u32 4294901760, %v1722_v51  ;;  %v1756_v6 = vsub.f32 %v1643_v17, %v83_v20  ;;  %v154_v7 = vand.u32 4294901760, %v1729_v56 }
  0x34   :  { %1313 = vmatpush3.bf16.msra.mxu1 %v1647_v18  ;;  %1385 = vmatpush3.bf16.msra.mxu0 %v1647_v18  ;;  %v1760_v8 = vsub.f32 %v42_v49, %v1731_v57  ;;  %v1762_v9 = vand.u32 4294901760, %v43_v62  ;;  %v1770_v10 = vpack.c.bf16 %v2012_v55, %v2013_v54  ;;  %v197_v11 = vand.u32 4294901760, %v196_v59 }
  0x35   :  { %1314 = vmatprep.subr.bf16.mxu1 %v1578_v0  ;;  %1386 = vmatprep.subr.bf16.mxu0 %v1578_v0  ;;  %v204_v14 = vand.u32 4294901760, %v203_v60  ;;  %v217_v15 = vsub.f32 %v1698_v40, %v216_v61  ;;  %v1776_v17 = vsub.f32 %v1653_v21, %v86_v25  ;;  %v1781_v19 = vsub.f32 %v1655_v22, %v89_v26 }
  0x36   :  { %v1402_v20 = vpack.c.bf16 %v202_v48, %v195_v47  ;;  %v146_v23 = vand.u32 4294901760, %v145_v2  ;;  %v211_v36 = vand.u32 4294901760, %v210_v3  ;;  %v224_v49 = vsub.f32 %v1720_v50, %v223_v4 }
  0x37   :  { %v231_v21 = vsub.f32 %v1722_v51, %v2014_v5  ;;  %v155_v25 = vsub.f32 %v1729_v56, %v154_v7  ;;  %v164_v22 = vand.u32 4294901760, %v1760_v8  ;;  %v1794_v26 = vsub.f32 %v43_v62, %v1762_v9 }
  0x38   :  { %1316 = vmatpush3.bf16.msra.mxu1 %v1661_v24  ;;  %1388 = vmatpush3.bf16.msra.mxu0 %v1661_v24  ;;  %v1796_v59 = vand.u32 4294901760, %v44_v16  ;;  %v1330_v47 = vpack.c.bf16 %v204_v14, %v197_v11  ;;  %v218_v48 = vand.u32 4294901760, %v217_v15  ;;  %v237_v60 = vand.u32 4294901760, %v1745_v63 }
  0x39   :  { %1317 = vmatprep.subr.bf16.mxu1 %v1578_v0  ;;  %1389 = vmatprep.subr.bf16.mxu0 %v1578_v0  ;;  %v244_v2 = vand.u32 4294901760, %v1756_v6  ;;  %v1805_v3 = vsub.f32 %v1667_v27, %v92_v33  ;;  %v1810_v62 = vsub.f32 %v1669_v28, %v95_v34  ;;  %v1405_v11 = vpack.c.bf16 %v216_v61, %v209_v53 }
  0x3a   :  { %v225_v14 = vand.u32 4294901760, %v224_v49  ;;  %v251_v15 = vand.u32 4294901760, %v1776_v17  ;;  %v258_v55 = vand.u32 4294901760, %v1781_v19  ;;  %v156_v54 = vand.u32 4294901760, %v155_v25 }
  0x3b   :  { %v165_v27 = vsub.f32 %v1760_v8, %v164_v22  ;;  %v174_v33 = vand.u32 4294901760, %v1794_v26  ;;  %v1819_v28 = vsub.f32 %v44_v16, %v1796_v59  ;;  %v1333_v34 = vpack.c.bf16 %v218_v48, %v211_v36 }
  0x3c   :  { %1319 = vmatpush3.bf16.msra.mxu1 %v1683_v32  ;;  %1391 = vmatpush3.bf16.msra.mxu0 %v1683_v32  ;;  %v232_v5 = vand.u32 4294901760, %v231_v21  ;;  %v238_v53 = vsub.f32 %v1745_v63, %v237_v60  ;;  %v245_v61 = vsub.f32 %v1756_v6, %v244_v2  ;;  %v1833_v16 = vsub.f32 %v1691_v37, %v101_v44 }
  0x3d   :  { %1320 = vmatprep.subr.bf16.mxu1 %v1578_v0  ;;  %1392 = vmatprep.subr.bf16.mxu0 %v1578_v0  ;;  %v272_v36 = vand.u32 4294901760, %v1810_v62  ;;  %v175_v37 = vsub.f32 %v1794_v26, %v174_v33  ;;  %v184_v44 = vand.u32 4294901760, %v1819_v28  ;;  %v2015_v21 = vand.u32 4294901760, %v1722_v51 }
  0x3e   :  { %v1336_v49 = vpack.c.bf16 %v232_v5, %v225_v14  ;;  %v246_v48 = vand.u32 4294901760, %v245_v61  ;;  %v1411_v61 = vpack.c.bf16 %v244_v2, %v237_v60 }
  0x3f   :  { %v1408_v25 = vpack.c.bf16 %v2015_v21, %v223_v4  ;;  %v286_v21 = vand.u32 4294901760, %v1833_v16 }
  0x40   :  { %1322 = vmatpush3.bf16.msra.mxu1 %v1709_v43  ;;  %1394 = vmatpush3.bf16.msra.mxu0 %v1709_v43 }
  0x41   :  { %1323 = vmatprep.subr.bf16.mxu1 %v1578_v0  ;;  %1395 = vmatprep.subr.bf16.mxu0 %v1578_v0 }
  0x44   :  { %1325 = vmatpush3.bf16.msra.mxu1 %v1739_v58  ;;  %1397 = vmatpush3.bf16.msra.mxu0 %v1739_v58 }
  0x45   :  { %1326 = vmatprep.subr.bf16.mxu1 %v1578_v0  ;;  %1398 = vmatprep.subr.bf16.mxu0 %v1578_v0 }
  0x48   :  { %1328 = vmatpush3.bf16.msra.mxu1 %v1770_v10  ;;  %1400 = vmatpush3.bf16.msra.mxu0 %v1770_v10 }
  0x49   :  { %1329 = vmatprep.subr.bf16.mxu1 %v1578_v0  ;;  %1401 = vmatprep.subr.bf16.mxu0 %v1578_v0 }
  0x4b   :  { %1056 = vmatmul.mubr.f32.vlgmr.msra.gmra.mrb[0].mxu1 %v146_v23  ;;  %1197 = vmatmul.mubr.f32.vlgmr.msra.gmra.mrb[0].mxu0 %v144_v52  ;;  %v1826_v52 = vsub.f32 %v1687_v35, %v98_v41  ;;  %v259_v35 = vsub.f32 %v1781_v19, %v258_v55  ;;  %v265_v41 = vand.u32 4294901760, %v1805_v3  ;;  %v166_v23 = vand.u32 4294901760, %v165_v27 }
  0x4c   :  { %1331 = vmatpush3.bf16.msra.mxu1 %v1330_v47  ;;  %1403 = vmatpush3.bf16.msra.mxu0 %v1402_v20  ;;  %v252_v20 = vsub.f32 %v1776_v17, %v251_v15  ;;  %v239_v47 = vand.u32 4294901760, %v238_v53  ;;  %v2017_v27 = vand.u32 4294901760, %v1714_v46  ;;  %v185_v53 = vsub.f32 %v1819_v28, %v184_v44 }
  0x4d   :  { %1332 = vmatprep.subr.bf16.mxu1 %v1578_v0  ;;  %1404 = vmatprep.subr.bf16.mxu0 %v1578_v0  ;;  %v266_v4 = vsub.f32 %v1805_v3, %v265_v41  ;;  %v260_v14 = vand.u32 4294901760, %v259_v35  ;;  %v1414_v35 = vpack.c.bf16 %v258_v55, %v251_v15 }
  0x4e   :  { %1058 = vmatprep.mubr.msk.f32.mxu1 %vm1579_vm0, %v1580_v1  ;;  %1199 = vmatprep.mubr.msk.f32.mxu0 %vm1579_vm0, %v1580_v1  ;;  %v1859_v5 = vsub.f32 %v1714_v46, %v2017_v27  ;;  %v1339_v46 = vpack.c.bf16 %v246_v48, %v239_v47  ;;  %v186_v60 = vand.u32 4294901760, %v185_v53 }
  0x4f   :  { %1059 = vmatmul.mubr.f32.gmra.mrb[2].mxu1 %v156_v54  ;;  %1200 = vmatmul.mubr.f32.gmra.mrb[2].mxu0 %v154_v7  ;;  %v2016_v54 = vand.u32 4294901760, %v1712_v45 }
  0x50   :  { %1334 = vmatpush3.bf16.msra.mxu1 %v1333_v34  ;;  %1406 = vmatpush3.bf16.msra.mxu0 %v1405_v11  ;;  %v253_v11 = vand.u32 4294901760, %v252_v20  ;;  %v273_v34 = vsub.f32 %v1810_v62, %v272_v36  ;;  %v279_v20 = vand.u32 4294901760, %v1826_v52  ;;  %v300_v15 = vand.u32 4294901760, %v1859_v5 }
  0x51   :  { %1335 = vmatprep.subr.bf16.mxu1 %v1578_v0  ;;  %1407 = vmatprep.subr.bf16.mxu0 %v1578_v0  ;;  %v1854_v7 = vsub.f32 %v1712_v45, %v2016_v54  ;;  %v176_v45 = vand.u32 4294901760, %v175_v37 }
  0x52   :  { %1061 = vmatprep.mubr.msk.f32.mxu1 %vm1579_vm0, %v1580_v1  ;;  %1202 = vmatprep.mubr.msk.f32.mxu0 %vm1579_vm0, %v1580_v1  ;;  %v274_v37 = vand.u32 4294901760, %v273_v34  ;;  %v280_v2 = vsub.f32 %v1826_v52, %v279_v20  ;;  %v301_v27 = vsub.f32 %v1859_v5, %v300_v15  ;;  %v1354_v34 = vpack.c.bf16 %v1675_v31, %v1673_v30 }
  0x53   :  { %1062 = vmatmul.mubr.f32.gmra.mrb[4].mxu1 %v166_v23  ;;  %1203 = vmatmul.mubr.f32.gmra.mrb[4].mxu0 %v164_v22  ;;  %v1342_v22 = vpack.c.bf16 %v260_v14, %v253_v11  ;;  %v267_v23 = vand.u32 4294901760, %v266_v4  ;;  %v293_v55 = vand.u32 4294901760, %v1854_v7  ;;  %v1372_v30 = vpack.c.bf16 %v1833_v16, %v1826_v52 }
  0x54   :  { %1337 = vmatpush3.bf16.msra.mxu1 %v1336_v49  ;;  %1409 = vmatpush3.bf16.msra.mxu0 %v1408_v25  ;;  %v287_v49 = vsub.f32 %v1833_v16, %v286_v21  ;;  %v1417_v25 = vpack.c.bf16 %v272_v36, %v265_v41  ;;  %v281_v47 = vand.u32 4294901760, %v280_v2  ;;  %v1420_v36 = vpack.c.bf16 %v286_v21, %v279_v20 }
  0x55   :  { %1338 = vmatprep.subr.bf16.mxu1 %v1578_v0  ;;  %1410 = vmatprep.subr.bf16.mxu0 %v1578_v0  ;;  %v294_v54 = vsub.f32 %v1854_v7, %v293_v55  ;;  %v302_v11 = vand.u32 4294901760, %v301_v27  ;;  %v1423_v14 = vpack.c.bf16 %v300_v15, %v293_v55  ;;  %v1375_v31 = vpack.c.bf16 %v1859_v5, %v1854_v7 }
  0x56   :  { %1064 = vmatprep.mubr.msk.f32.mxu1 %vm1579_vm0, %v1580_v1  ;;  %1205 = vmatprep.mubr.msk.f32.mxu0 %vm1579_vm0, %v1580_v1  ;;  %v288_v48 = vand.u32 4294901760, %v287_v49 }
  0x57   :  { %1065 = vmatmul.mubr.f32.gmra.mrb[6].mxu1 %v176_v45  ;;  %1206 = vmatmul.mubr.f32.gmra.mrb[6].mxu0 %v174_v33  ;;  %v1345_v33 = vpack.c.bf16 %v274_v37, %v267_v23  ;;  %v1357_v45 = vpack.c.bf16 %v1698_v40, %v1693_v38 }
  0x58   :  { %1340 = vmatpush3.bf16.msra.mxu1 %v1339_v46  ;;  %1412 = vmatpush3.bf16.msra.mxu0 %v1411_v61  ;;  %v1348_v41 = vpack.c.bf16 %v288_v48, %v281_v47 }
  0x59   :  { %1341 = vmatprep.subr.bf16.mxu1 %v1578_v0  ;;  %1413 = vmatprep.subr.bf16.mxu0 %v1578_v0 }
  0x5a   :  { %1067 = vmatprep.mubr.msk.f32.mxu1 %vm1579_vm0, %v1580_v1  ;;  %1208 = vmatprep.mubr.msk.f32.mxu0 %vm1579_vm0, %v1580_v1 }
  0x5b   :  { %1068 = vmatmul.mubr.f32.gmra.mrb[8].mxu1 %v186_v60  ;;  %1209 = vmatmul.mubr.f32.gmra.mrb[8].mxu0 %v184_v44  ;;  %v295_v44 = vand.u32 4294901760, %v294_v54 }
  0x5c   :  { %1343 = vmatpush3.bf16.msra.mxu1 %v1342_v22  ;;  %1415 = vmatpush3.bf16.msra.mxu0 %v1414_v35 }
  0x5d   :  { %1344 = vmatprep.subr.bf16.mxu1 %v1578_v0  ;;  %1416 = vmatprep.subr.bf16.mxu0 %v1578_v0  ;;  %v1351_v4 = vpack.c.bf16 %v302_v11, %v295_v44 }
  0x5e   :  { %1102 = vmatprep.mubr.msk.f32.mxu1 %vm1579_vm0, %v1580_v1  ;;  %1243 = vmatprep.mubr.msk.f32.mxu0 %vm1579_vm0, %v1580_v1 }
  0x60   :  { %1346 = vmatpush3.bf16.msra.mxu1 %v1345_v33  ;;  %1418 = vmatpush3.bf16.msra.mxu0 %v1417_v25 }
  0x61   :  { %1347 = vmatprep.subr.bf16.mxu1 %v1578_v0  ;;  %1419 = vmatprep.subr.bf16.mxu0 %v1578_v0 }
  0x64   :  { %1349 = vmatpush3.bf16.msra.mxu1 %v1348_v41  ;;  %1421 = vmatpush3.bf16.msra.mxu0 %v1420_v36 }
  0x65   :  { %1350 = vmatprep.subr.bf16.mxu1 %v1578_v0  ;;  %1422 = vmatprep.subr.bf16.mxu0 %v1578_v0 }
  0x68   :  { %1352 = vmatpush3.bf16.msra.mxu1 %v1351_v4  ;;  %1424 = vmatpush3.bf16.msra.mxu0 %v1423_v14 }
  0x69   :  { %1353 = vmatprep.subr.bf16.mxu1 %v1578_v0  ;;  %1425 = vmatprep.subr.bf16.mxu0 %v1578_v0 }
  0x6b   :  { %1103 = vmatmul.mubr.f32.vlgmr.msra.gmra.mrb[0].mxu1 %v1671_v29  ;;  %1244 = vmatmul.mubr.f32.vlgmr.msra.gmra.mrb[0].mxu0 %v1671_v29 }
  0x6c   :  { %1355 = vmatpush3.bf16.msra.mxu1 %v1354_v34  ;;  %1427 = vmatpush3.bf16.msra.mxu0 %v1633_v12  ;;  %v1360_v12 = vpack.c.bf16 %v1722_v51, %v1720_v50 }
  0x6d   :  { %1356 = vmatprep.subr.bf16.mxu1 %v1578_v0  ;;  %1428 = vmatprep.subr.bf16.mxu0 %v1578_v0 }
  0x6e   :  { %1105 = vmatprep.mubr.msk.f32.mxu1 %vm1579_vm0, %v1580_v1  ;;  %1246 = vmatprep.mubr.msk.f32.mxu0 %vm1579_vm0, %v1580_v1 }
  0x6f   :  { %1106 = vmatmul.mubr.f32.gmra.mrb[2].mxu1 %v1701_v42  ;;  %1247 = vmatmul.mubr.f32.gmra.mrb[2].mxu0 %v1701_v42 }
  0x70   :  { %1358 = vmatpush3.bf16.msra.mxu1 %v1357_v45  ;;  %1430 = vmatpush3.bf16.msra.mxu0 %v1637_v13  ;;  %v1363_v13 = vpack.c.bf16 %v1756_v6, %v1745_v63 }
  0x71   :  { %1359 = vmatprep.subr.bf16.mxu1 %v1578_v0  ;;  %1431 = vmatprep.subr.bf16.mxu0 %v1578_v0 }
  0x72   :  { %1108 = vmatprep.mubr.msk.f32.mxu1 %vm1579_vm0, %v1580_v1  ;;  %1249 = vmatprep.mubr.msk.f32.mxu0 %vm1579_vm0, %v1580_v1 }
  0x73   :  { %1109 = vmatmul.mubr.f32.gmra.mrb[4].mxu1 %v1731_v57  ;;  %1250 = vmatmul.mubr.f32.gmra.mrb[4].mxu0 %v1731_v57 }
  0x74   :  { %1361 = vmatpush3.bf16.msra.mxu1 %v1360_v12  ;;  %1433 = vmatpush3.bf16.msra.mxu0 %v1647_v18  ;;  %v1366_v18 = vpack.c.bf16 %v1781_v19, %v1776_v17 }
  0x75   :  { %1362 = vmatprep.subr.bf16.mxu1 %v1578_v0  ;;  %1434 = vmatprep.subr.bf16.mxu0 %v1578_v0 }
  0x76   :  { %1111 = vmatprep.mubr.msk.f32.mxu1 %vm1579_vm0, %v1580_v1  ;;  %1252 = vmatprep.mubr.msk.f32.mxu0 %vm1579_vm0, %v1580_v1 }
  0x77   :  { %1112 = vmatmul.mubr.f32.gmra.mrb[6].mxu1 %v1762_v9  ;;  %1253 = vmatmul.mubr.f32.gmra.mrb[6].mxu0 %v1762_v9 }
  0x78   :  { %1364 = vmatpush3.bf16.msra.mxu1 %v1363_v13  ;;  %1436 = vmatpush3.bf16.msra.mxu0 %v1661_v24  ;;  %v1369_v24 = vpack.c.bf16 %v1810_v62, %v1805_v3 }
  0x79   :  { %1365 = vmatprep.subr.bf16.mxu1 %v1578_v0  ;;  %1437 = vmatprep.subr.bf16.mxu0 %v1578_v0 }
  0x7a   :  { %1114 = vmatprep.mubr.msk.f32.mxu1 %vm1579_vm0, %v1580_v1  ;;  %1255 = vmatprep.mubr.msk.f32.mxu0 %vm1579_vm0, %v1580_v1 }
  0x7b   :  { %1115 = vmatmul.mubr.f32.gmra.mrb[8].mxu1 %v1796_v59  ;;  %1256 = vmatmul.mubr.f32.gmra.mrb[8].mxu0 %v1796_v59 }
  0x7c   :  { %1367 = vmatpush3.bf16.msra.mxu1 %v1366_v18  ;;  %1439 = vmatpush3.bf16.msra.mxu0 %v1683_v32 }
  0x7d   :  { %1368 = vmatprep.subr.bf16.mxu1 %v1578_v0  ;;  %1440 = vmatprep.subr.bf16.mxu0 %v1578_v0 }
  0x7e   :  { %1149 = vmatprep.mubr.msk.f32.mxu1 %vm1579_vm0, %v1580_v1  ;;  %1290 = vmatprep.mubr.msk.f32.mxu0 %vm1579_vm0, %v1580_v1 }
  0x80   :  { %1370 = vmatpush3.bf16.msra.mxu1 %v1369_v24  ;;  %1442 = vmatpush3.bf16.msra.mxu0 %v1709_v43 }
  0x81   :  { %1371 = vmatprep.subr.bf16.mxu1 %v1578_v0  ;;  %1443 = vmatprep.subr.bf16.mxu0 %v1578_v0 }
  0x84   :  { %1373 = vmatpush3.bf16.msra.mxu1 %v1372_v30  ;;  %1445 = vmatpush3.bf16.msra.mxu0 %v1739_v58 }
  0x85   :  { %1374 = vmatprep.subr.bf16.mxu1 %v1578_v0  ;;  %1446 = vmatprep.subr.bf16.mxu0 %v1578_v0 }
  0x88   :  { %1376 = vmatpush3.bf16.msra.mxu1 %v1375_v31  ;;  %1448 = vmatpush3.bf16.msra.mxu0 %v1770_v10 }
  0x8b   :  { %1150 = vmatmul.mubr.f32.vlgmr.msra.gmra.mrb[0].mxu1 %v1696_v39  ;;  %1291 = vmatmul.mubr.f32.vlgmr.msra.gmra.mrb[0].mxu0 %v1671_v29 }
  0x8c   :  { %1152 = vmatprep.mubr.msk.f32.mxu1 %vm1579_vm0, %v1580_v1  ;;  %1293 = vmatprep.mubr.msk.f32.mxu0 %vm1579_vm0, %v1580_v1 }
  0x8f   :  { %1153 = vmatmul.mubr.f32.gmra.mrb[2].mxu1 %v1729_v56  ;;  %1294 = vmatmul.mubr.f32.gmra.mrb[2].mxu0 %v1701_v42 }
  0x90   :  { %1155 = vmatprep.mubr.msk.f32.mxu1 %vm1579_vm0, %v1580_v1  ;;  %1296 = vmatprep.mubr.msk.f32.mxu0 %vm1579_vm0, %v1580_v1 }
  0x93   :  { %1156 = vmatmul.mubr.f32.gmra.mrb[4].mxu1 %v1760_v8  ;;  %1297 = vmatmul.mubr.f32.gmra.mrb[4].mxu0 %v1731_v57 }
  0x94   :  { %1158 = vmatprep.mubr.msk.f32.mxu1 %vm1579_vm0, %v1580_v1  ;;  %1299 = vmatprep.mubr.msk.f32.mxu0 %vm1579_vm0, %v1580_v1 }
  0x97   :  { %1159 = vmatmul.mubr.f32.gmra.mrb[6].mxu1 %v1794_v26  ;;  %1300 = vmatmul.mubr.f32.gmra.mrb[6].mxu0 %v1762_v9 }
  0x98   :  { %1161 = vmatprep.mubr.msk.f32.mxu1 %vm1579_vm0, %v1580_v1  ;;  %1302 = vmatprep.mubr.msk.f32.mxu0 %vm1579_vm0, %v1580_v1 }
  0x9b   :  { %1162 = vmatmul.mubr.f32.gmra.mrb[8].mxu1 %v1819_v28  ;;  %1303 = vmatmul.mubr.f32.gmra.mrb[8].mxu0 %v1796_v59 }
 0x15e   :  { %v467_v0 = vpop.f32.mrb[0].mxu1  ;;  %v846_v29 = vpop.f32.mrb[0].mxu0 }
 0x15f   :  { %v1449_v32 = vadd.f32 %v846_v29, %v467_v0  ;;  %v1151_v38 = vpop.f32.mrb[1].mxu1  ;;  %v1292_v39 = vpop.f32.mrb[1].mxu0 }
 0x161   :  { %874 = vst [vmem:[#allocation7] sm:$0xff] %v1449_v32 }
 0x162   :  { %v474_v40 = vpop.f32.mrb[2].mxu1  ;;  %v852_v42 = vpop.f32.mrb[2].mxu0 }
 0x163   :  { %v1450_v43 = vadd.f32 %v852_v42, %v474_v40  ;;  %v1154_v50 = vpop.f32.mrb[3].mxu1  ;;  %v1295_v51 = vpop.f32.mrb[3].mxu0 }
 0x165   :  { %875 = vst [vmem:[#allocation7 + $0x8] sm:$0xff] %v1450_v43 }
 0x166   :  { %v481_v56 = vpop.f32.mrb[4].mxu1  ;;  %v858_v57 = vpop.f32.mrb[4].mxu0 }
 0x167   :  { %v1451_v58 = vadd.f32 %v858_v57, %v481_v56  ;;  %v1157_v1 = vpop.f32.mrb[5].mxu1  ;;  %v1298_v63 = vpop.f32.mrb[5].mxu0 }
 0x169   :  { %876 = vst [vmem:[#allocation7 + $0x10] sm:$0xff] %v1451_v58 }
 0x16a   :  { %v488_v6 = vpop.f32.mrb[6].mxu1  ;;  %v864_v8 = vpop.f32.mrb[6].mxu0 }
 0x16b   :  { %v1452_v9 = vadd.f32 %v864_v8, %v488_v6  ;;  %v1160_v10 = vpop.f32.mrb[7].mxu1  ;;  %v1301_v17 = vpop.f32.mrb[7].mxu0 }
 0x16d   :  { %877 = vst [vmem:[#allocation7 + $0x18] sm:$0xff] %v1452_v9 }
 0x16e   :  { %v495_v19 = vpop.f32.mrb[8].mxu1  ;;  %v870_v26 = vpop.f32.mrb[8].mxu0 }
 0x16f   :  { %v1453_v59 = vadd.f32 %v870_v26, %v495_v19  ;;  %v1163_v3 = vpop.f32.mrb[9].mxu1  ;;  %v1304_v62 = vpop.f32.mrb[9].mxu0 }
 0x171   :  { %878 = vst [vmem:[#allocation7 + $0x20] sm:$0x1f] %v1453_v59 }
 0x172   :  { %1557 = shalt.err (!%p1554_p6)
}
 0x173   :  { %s1558_s10 = scalar_lea.hbm %s2011_s2, 640 }
 0x174   :  { %p1559_p7 = scmp.ne.s32.totalorder %s2011_s2, %s1558_s10  ;;  %p1562_p8 = scmp.lt.u32.totalorder %s1558_s10, %s2011_s2 }
 0x176   :  { %p1564_p9 = pnand %p1562_p8, %p1559_p7 }
 0x178   :  { %1567 = shalt.err (!%p1564_p9)
}
 0x179   :  { %890 = dma.vmem_to_hbm [thread:$0]  %s885_s6, 640, %s2011_s2, [#allocation4], %s1575_s19, %s1575_s19, %s1576_s20  }
 0x17a   :  { %1572 = dma.done.wait [#allocation4], 640  }
 0x17b   :  { %1573 = vsyncadd [#allocation4], 4294966656 }
 0x17c   :  { %894 = vsyncpa [#allocation3], 1 }
 0x17d   :  { %895 = vsyncpa [#allocation6], 1 }
 0x17e   :  { %896 = vsyncpa [#allocation4], 1 }

</bundles_post_ra>
